<compile_context>
chip_gen: v7x
topology: tpu7x:2x2x1
jax: 0.10.0
libtpu: 0.0.40
codegen_flags: <defaults>
</compile_context>

<pallas_src>
import functools

import jax
import jax.numpy as jnp
from jax.experimental import pallas as pl
from jax.experimental.pallas import tpu as pltpu

_LANE = 128
_MASK = -1e30  # fill for padded logit lanes so log_softmax ignores them


def _round_up(x, m):
    return ((x + m - 1) // m) * m


def _pick_tile(n, candidates):
    for t in candidates:
        if t <= n and n % t == 0:
            return t
    return n


def _pad_to(a, shape, value=0.0):
    pads = [(0, t - s) for s, t in zip(a.shape, shape)]
    return jnp.pad(a, pads, constant_values=value)


# ----------------------------------------------------------------------------
# Pallas kernels
# ----------------------------------------------------------------------------
def _rgcn_conv_kernel(adj_ref, xk_ref, xi_ref, wrel_ref, wroot_ref, b_ref,
                      out_ref, acc_ref, *, xw_first):
    k = pl.program_id(1)

    @pl.when(k == 0)
    def _():
        acc_ref[...] = jnp.zeros_like(acc_ref)

    if xw_first:
        # (x @ W_rel) first: carries d_out through the O(N^2) term.
        xw = jnp.dot(xk_ref[...], wrel_ref[...],
                     preferred_element_type=jnp.float32)
        acc_ref[...] += jnp.dot(adj_ref[...], xw.astype(adj_ref.dtype),
                                preferred_element_type=jnp.float32)
    else:
        # (adj @ x) first: carries d_in through the O(N^2) term.
        agg = jnp.dot(adj_ref[...], xk_ref[...],
                      preferred_element_type=jnp.float32)
        acc_ref[...] += jnp.dot(agg.astype(wrel_ref.dtype), wrel_ref[...],
                                preferred_element_type=jnp.float32)

    @pl.when(k == pl.num_programs(1) - 1)
    def _():
        root = jnp.dot(xi_ref[...], wroot_ref[...],
                       preferred_element_type=jnp.float32)
        out_ref[...] = jnp.maximum(acc_ref[...] + root + b_ref[...],
                                   0.0).astype(out_ref.dtype)


def _head_kernel(*refs, n_meta):
    e_refs = refs[:n_meta]
    w1_ref, b1_ref, w2_ref, b2_ref, out_ref = refs[n_meta:]
    # Fused concat: concat(e_0..e_{M-1}) @ fc1 == sum_m e_m @ fc1_block_m.
    acc = None
    for m in range(n_meta):
        t = jnp.dot(e_refs[m][...], w1_ref[m],
                    preferred_element_type=jnp.float32)
        acc = t if acc is None else acc + t
    h = jnp.maximum(acc + b1_ref[...], 0.0)
    logits = jnp.dot(h.astype(w2_ref.dtype), w2_ref[...],
                     preferred_element_type=jnp.float32) + b2_ref[...]
    # log_softmax over lanes; padded lanes carry ~-1e30 bias -> contribute 0.
    mx = jnp.max(logits, axis=1, keepdims=True)
    lse = mx + jnp.log(jnp.sum(jnp.exp(logits - mx), axis=1, keepdims=True))
    out_ref[...] = logits - lse


# ----------------------------------------------------------------------------
# pallas_call wrappers
# ----------------------------------------------------------------------------
def rgcn_conv(adj, x, w_rel, w_root, bias, *, xw_first):
    n_pad = adj.shape[0]
    din_pad = x.shape[1]
    dout_pad = w_rel.shape[1]
    tm = _pick_tile(n_pad, (256, 128))
    tk = _pick_tile(n_pad, (512, 256, 128))
    carried = dout_pad if xw_first else din_pad
    cost = pl.CostEstimate(
        flops=2 * n_pad * n_pad * carried + 4 * n_pad * din_pad * dout_pad,
        transcendentals=0,
        bytes_accessed=(n_pad * n_pad * 2 + 2 * n_pad * din_pad * 2
                        + 2 * din_pad * dout_pad * 2 + dout_pad * 4
                        + n_pad * dout_pad * 2),
    )
    return pl.pallas_call(
        functools.partial(_rgcn_conv_kernel, xw_first=xw_first),
        out_shape=jax.ShapeDtypeStruct((n_pad, dout_pad), jnp.bfloat16),
        grid=(n_pad // tm, n_pad // tk),
        in_specs=[
            pl.BlockSpec((tm, tk), lambda i, k: (i, k)),           # adj tile
            pl.BlockSpec((tk, din_pad), lambda i, k: (k, 0)),      # x rows (K)
            pl.BlockSpec((tm, din_pad), lambda i, k: (i, 0)),      # x rows (M)
            pl.BlockSpec((din_pad, dout_pad), lambda i, k: (0, 0)),  # w_rel
            pl.BlockSpec((din_pad, dout_pad), lambda i, k: (0, 0)),  # w_root
            pl.BlockSpec((1, dout_pad), lambda i, k: (0, 0)),        # bias
        ],
        out_specs=pl.BlockSpec((tm, dout_pad), lambda i, k: (i, 0)),
        scratch_shapes=[pltpu.VMEM((tm, dout_pad), jnp.float32)],
        compiler_params=pltpu.CompilerParams(
            dimension_semantics=("parallel", "arbitrary")),
        cost_estimate=cost,
    )(adj, x, x, w_rel, w_root, bias)


def mlp_head(embeddings, w1, b1, w2, b2):
    n_meta = len(embeddings)
    n_pad, h_pad = embeddings[0].shape
    o_pad = w2.shape[1]
    tm = _pick_tile(n_pad, (256, 128))
    cost = pl.CostEstimate(
        flops=2 * n_pad * h_pad * h_pad * n_meta + 2 * n_pad * h_pad * o_pad,
        transcendentals=n_pad * (o_pad + 1),
        bytes_accessed=(n_meta * n_pad * h_pad * 2 + n_meta * h_pad * h_pad * 2
                        + h_pad * 4 + h_pad * o_pad * 2 + o_pad * 4
                        + n_pad * o_pad * 4),
    )
    in_specs = ([pl.BlockSpec((tm, h_pad), lambda i: (i, 0))
                 for _ in range(n_meta)]
                + [pl.BlockSpec(w1.shape, lambda i: (0, 0, 0)),
                   pl.BlockSpec(b1.shape, lambda i: (0, 0)),
                   pl.BlockSpec(w2.shape, lambda i: (0, 0)),
                   pl.BlockSpec(b2.shape, lambda i: (0, 0))])
    return pl.pallas_call(
        functools.partial(_head_kernel, n_meta=n_meta),
        out_shape=jax.ShapeDtypeStruct((n_pad, o_pad), jnp.float32),
        grid=(n_pad // tm,),
        in_specs=in_specs,
        out_specs=pl.BlockSpec((tm, o_pad), lambda i: (i, 0)),
        compiler_params=pltpu.CompilerParams(
            dimension_semantics=("parallel",)),
        cost_estimate=cost,
    )(*embeddings, w1, b1, w2, b2)


# ----------------------------------------------------------------------------
# Model (parameter setup + graph glue in plain JAX, hot path in Pallas)
# ----------------------------------------------------------------------------
class MPNetmPallas:
    def __init__(self, key, input_dim, hidden_dim, num_rel, output_dim,
                 ll_output_dim, n_metapaths, metapaths):
        del output_dim  # unused in the reference forward pass
        self.metapaths = metapaths
        self.n_metapaths = n_metapaths
        self.num_rel = num_rel
        self.input_dim = input_dim
        self.hidden_dim = hidden_dim
        self.ll_output_dim = ll_output_dim

        self.din_pad = _round_up(input_dim, _LANE)
        self.h_pad = _round_up(hidden_dim, _LANE)
        self.o_pad = _round_up(ll_output_dim, _LANE)

        def init(key, shape, scale=0.1):
            return scale * jax.random.normal(key, shape, dtype=jnp.float32)

        self.layers_list = []  # per metapath: list of conv params (padded)
        for i in range(len(metapaths)):
            convs = []
            dims = [input_dim] + [hidden_dim] * len(metapaths[i])
            for j in range(len(metapaths[i])):
                d_in, d_out = dims[j], dims[j + 1]
                d_in_pad = self.din_pad if j == 0 else self.h_pad
                key, k1, k2, k3 = jax.random.split(key, 4)
                convs.append({
                    "w_rel": _pad_to(init(k1, (num_rel, d_in, d_out)),
                                     (num_rel, d_in_pad, self.h_pad)
                                     ).astype(jnp.bfloat16),
                    "w_root": _pad_to(init(k2, (d_in, d_out)),
                                      (d_in_pad, self.h_pad)
                                      ).astype(jnp.bfloat16),
                    "bias": _pad_to(init(k3, (1, d_out)), (1, self.h_pad)),
                    # associate as adj@(xW) only when it shrinks the O(N^2) operand
                    "xw_first": d_out < d_in,
                })
            self.layers_list.append(convs)

        n_meta = len(metapaths)
        key, k1, k2, k3, k4 = jax.random.split(key, 5)
        fc1_w = init(k1, (hidden_dim * n_meta, hidden_dim))
        # fc1 stored as per-metapath (h_pad, h_pad) blocks so the concat can be
        # fused into the head kernel (sum of block matmuls == concat @ fc1_w).
        self.fc1_w = jnp.stack([
            _pad_to(fc1_w[m * hidden_dim:(m + 1) * hidden_dim, :],
                    (self.h_pad, self.h_pad)) for m in range(n_meta)
        ]).astype(jnp.bfloat16)
        self.fc1_b = _pad_to(init(k2, (1, hidden_dim)), (1, self.h_pad))
        self.fc2_w = _pad_to(init(k3, (hidden_dim, ll_output_dim)),
                             (self.h_pad, self.o_pad)).astype(jnp.bfloat16)
        # padded logit lanes get a huge negative bias -> ignored by log_softmax
        self.fc2_b = _pad_to(init(k4, (1, ll_output_dim)), (1, self.o_pad),
                             value=_MASK)

        self._forward = jax.jit(self._forward_impl)

    @staticmethod
    def _relation_adjacency(edge_index, edge_type, rel, n_pad):
        # flow='target_to_source': message from dst -> src, aggregated at src.
        # Duplicate (src, dst) edges accumulate weight before normalization.
        src, dst = edge_index[0], edge_index[1]
        mask = (edge_type == rel).astype(jnp.float32)
        adj = jnp.zeros((n_pad, n_pad), jnp.float32).at[src, dst].add(mask)
        deg = jnp.sum(adj, axis=1, keepdims=True)
        return (adj / jnp.maximum(deg, 1.0)).astype(jnp.bfloat16)

    def _forward_impl(self, x, edge_index, edge_type):
        n = x.shape[0]
        n_pad = _round_up(n, _LANE)
        xp = jnp.zeros((n_pad, self.din_pad), jnp.bfloat16)
        xp = xp.at[:n, :self.input_dim].set(x.astype(jnp.bfloat16))

        # Build each relation's normalized adjacency once; reuse across all
        # metapaths/layers that share that relation.
        rels = sorted({int(r) for mp in self.metapaths for r in mp})
        adj_cache = {r: self._relation_adjacency(edge_index, edge_type, r, n_pad)
                     for r in rels}

        embeddings = []
        for i, mp in enumerate(self.metapaths):
            h = xp
            for j, rel in enumerate(mp):
                p = self.layers_list[i][j]
                h = rgcn_conv(adj_cache[rel], h, p["w_rel"][rel], p["w_root"],
                              p["bias"], xw_first=p["xw_first"])
            embeddings.append(h)

        out = mlp_head(embeddings, self.fc1_w, self.fc1_b,
                       self.fc2_w, self.fc2_b)
        return out[:n, :self.ll_output_dim]

    def __call__(self, x, edge_index, edge_type):
        return self._forward(x, edge_index, edge_type)


# ----------------------------------------------------------------------------
# Demo
# ----------------------------------------------------------------------------
if __name__ == "__main__":
    key = jax.random.PRNGKey(0)

    num_nodes = 8
    input_dim = 16
    hidden_dim = 32
    num_rel = 3
    output_dim = 32
    ll_output_dim = 4
    metapaths = [[0, 1], [2, 0]]
    n_metapaths = len(metapaths)
    num_edges = 24

    key, kx, ks, kd, kt, kp = jax.random.split(key, 6)
    x = jax.random.normal(kx, (num_nodes, input_dim), dtype=jnp.float32)
    src = jax.random.randint(ks, (num_edges,), 0, num_nodes, dtype=jnp.int32)
    dst = jax.random.randint(kd, (num_edges,), 0, num_nodes, dtype=jnp.int32)
    edge_index = jnp.stack([src, dst], axis=0)
    edge_type = jax.random.randint(kt, (num_edges,), 0, num_rel, dtype=jnp.int32)

    model = MPNetmPallas(kp, input_dim, hidden_dim, num_rel, output_dim,
                         ll_output_dim, n_metapaths, metapaths)

    out = model(x, edge_index, edge_type)
    out = jax.block_until_ready(out)

    assert out.shape == (num_nodes, ll_output_dim)
    # log_softmax rows should (approximately) exponentiate-sum to 1
    assert jnp.allclose(jnp.sum(jnp.exp(out), axis=1), 1.0, atol=1e-4)
    print("KERNEL_OK")
</pallas_src>

<mosaic_0001>
module attributes {stable_mosaic.version = 11 : i64} {
  func.func @_rgcn_conv_kernel(%arg0: i32, %arg1: i32, %arg2: memref<128x128xbf16, #tpu.memory_space<vmem>>, %arg3: memref<128x128xbf16, #tpu.memory_space<vmem>>, %arg4: memref<128x128xbf16, #tpu.memory_space<vmem>>, %arg5: memref<128x128xbf16, #tpu.memory_space<vmem>>, %arg6: memref<128x128xbf16, #tpu.memory_space<vmem>>, %arg7: memref<1x128xf32, #tpu.memory_space<vmem>>, %arg8: memref<128x128xbf16, #tpu.memory_space<vmem>>, %arg9: memref<128x128xf32, #tpu.memory_space<vmem>>) attributes {dimension_semantics = [#tpu.dimension_semantics<parallel>, #tpu.dimension_semantics<arbitrary>], iteration_bounds = array<i64: 1, 1>, scalar_prefetch = 0 : i64, scratch_operands = 1 : i64, tpu.core_type = #tpu.core_type<tc>, window_params = [{transform_indices = @transform_0, window_bounds = array<i64: 128, 128>}, {transform_indices = @transform_1, window_bounds = array<i64: 128, 128>}, {transform_indices = @transform_2, window_bounds = array<i64: 128, 128>}, {pipeline_mode = #tpu.pipeline_mode<synchronous>, transform_indices = @transform_3, window_bounds = array<i64: 128, 128>}, {pipeline_mode = #tpu.pipeline_mode<synchronous>, transform_indices = @transform_4, window_bounds = array<i64: 128, 128>}, {pipeline_mode = #tpu.pipeline_mode<synchronous>, transform_indices = @transform_5, window_bounds = array<i64: 1, 128>}, {transform_indices = @transform_6, window_bounds = array<i64: 128, 128>}]} {
    %c0_i32 = arith.constant 0 : i32
    %0 = arith.cmpi eq, %arg1, %c0_i32 : i32
    %1 = arith.extui %0 : i1 to i32
    %c0_i32_0 = arith.constant 0 : i32
    %2 = arith.cmpi ne, %1, %c0_i32_0 : i32
    scf.if %2 {
      %cst_13 = arith.constant 0.000000e+00 : f32
      %15 = vector.broadcast %cst_13 : f32 to vector<128x128xf32>
      %c0_14 = arith.constant 0 : index
      %c0_15 = arith.constant 0 : index
      %16 = vector.load %arg9[%c0_14, %c0_15] : memref<128x128xf32, #tpu.memory_space<vmem>>, vector<128x128xf32>
      tpu.vector_store %arg9[%c0_14, %c0_15], %15 {strides = array<i32>} : memref<128x128xf32, #tpu.memory_space<vmem>>, vector<128x128xf32>,
    } else {
    }
    %c0 = arith.constant 0 : index
    %c0_1 = arith.constant 0 : index
    %3 = vector.load %arg2[%c0, %c0_1] : memref<128x128xbf16, #tpu.memory_space<vmem>>, vector<128x128xbf16>
    %c0_2 = arith.constant 0 : index
    %c0_3 = arith.constant 0 : index
    %4 = vector.load %arg3[%c0_2, %c0_3] : memref<128x128xbf16, #tpu.memory_space<vmem>>, vector<128x128xbf16>
    %cst = arith.constant dense<0.000000e+00> : vector<128x128xf32>
    %5 = tpu.matmul %3, %4, %cst {dimension_numbers = #tpu.dot_dimension_numbers<[1], [0], [0], [1], [0, 0, 1, 1], [], []>} : vector<128x128xbf16>, vector<128x128xbf16>, vector<128x128xf32> -> vector<128x128xf32>
    %c0_4 = arith.constant 0 : index
    %c0_5 = arith.constant 0 : index
    %6 = vector.load %arg9[%c0_4, %c0_5] : memref<128x128xf32, #tpu.memory_space<vmem>>, vector<128x128xf32>
    %7 = arith.truncf %5 : vector<128x128xf32> to vector<128x128xbf16>
    %c0_6 = arith.constant 0 : index
    %c0_7 = arith.constant 0 : index
    %8 = vector.load %arg5[%c0_6, %c0_7] : memref<128x128xbf16, #tpu.memory_space<vmem>>, vector<128x128xbf16>
    %cst_8 = arith.constant dense<0.000000e+00> : vector<128x128xf32>
    %9 = tpu.matmul %7, %8, %cst_8 {dimension_numbers = #tpu.dot_dimension_numbers<[1], [0], [0], [1], [0, 0, 1, 1], [], []>} : vector<128x128xbf16>, vector<128x128xbf16>, vector<128x128xf32> -> vector<128x128xf32>
    %10 = arith.addf %6, %9 : vector<128x128xf32>
    %c0_9 = arith.constant 0 : index
    %c0_10 = arith.constant 0 : index
    %11 = vector.load %arg9[%c0_9, %c0_10] : memref<128x128xf32, #tpu.memory_space<vmem>>, vector<128x128xf32>
    tpu.vector_store %arg9[%c0_9, %c0_10], %10 {strides = array<i32>} : memref<128x128xf32, #tpu.memory_space<vmem>>, vector<128x128xf32>,
    %c0_i32_11 = arith.constant 0 : i32
    %12 = arith.cmpi eq, %arg1, %c0_i32_11 : i32
    %13 = arith.extui %12 : i1 to i32
    %c0_i32_12 = arith.constant 0 : i32
    %14 = arith.cmpi ne, %13, %c0_i32_12 : i32
    scf.if %14 {
      %c0_13 = arith.constant 0 : index
      %c0_14 = arith.constant 0 : index
      %15 = vector.load %arg4[%c0_13, %c0_14] : memref<128x128xbf16, #tpu.memory_space<vmem>>, vector<128x128xbf16>
      %c0_15 = arith.constant 0 : index
      %c0_16 = arith.constant 0 : index
      %16 = vector.load %arg6[%c0_15, %c0_16] : memref<128x128xbf16, #tpu.memory_space<vmem>>, vector<128x128xbf16>
      %cst_17 = arith.constant dense<0.000000e+00> : vector<128x128xf32>
      %17 = tpu.matmul %15, %16, %cst_17 {dimension_numbers = #tpu.dot_dimension_numbers<[1], [0], [0], [1], [0, 0, 1, 1], [], []>} : vector<128x128xbf16>, vector<128x128xbf16>, vector<128x128xf32> -> vector<128x128xf32>
      %c0_18 = arith.constant 0 : index
      %c0_19 = arith.constant 0 : index
      %18 = vector.load %arg9[%c0_18, %c0_19] : memref<128x128xf32, #tpu.memory_space<vmem>>, vector<128x128xf32>
      %19 = arith.addf %18, %17 : vector<128x128xf32>
      %c0_20 = arith.constant 0 : index
      %c0_21 = arith.constant 0 : index
      %20 = vector.load %arg7[%c0_20, %c0_21] : memref<1x128xf32, #tpu.memory_space<vmem>>, vector<1x128xf32>
      %21 = vector.broadcast %20 : vector<1x128xf32> to vector<128x128xf32>
      %22 = arith.addf %19, %21 : vector<128x128xf32>
      %cst_22 = arith.constant 0.000000e+00 : f32
      %23 = vector.broadcast %cst_22 : f32 to vector<128x128xf32>
      %24 = arith.maximumf %22, %23 : vector<128x128xf32>
      %25 = arith.truncf %24 : vector<128x128xf32> to vector<128x128xbf16>
      %c0_23 = arith.constant 0 : index
      %c0_24 = arith.constant 0 : index
      %26 = vector.load %arg8[%c0_23, %c0_24] : memref<128x128xbf16, #tpu.memory_space<vmem>>, vector<128x128xbf16>
      tpu.vector_store %arg8[%c0_23, %c0_24], %25 {strides = array<i32>} : memref<128x128xbf16, #tpu.memory_space<vmem>>, vector<128x128xbf16>,
    } else {
    }
    return
  }
  func.func @transform_0(%arg0: i32, %arg1: i32) -> (i32, i32) {
    %c0_i32 = arith.constant 0 : i32
    return %arg0, %arg1 : i32, i32
  }
  func.func @transform_1(%arg0: i32, %arg1: i32) -> (i32, i32) {
    %c0_i32 = arith.constant 0 : i32
    %c0_i32_0 = arith.constant 0 : i32
    return %arg1, %c0_i32 : i32, i32
  }
  func.func @transform_2(%arg0: i32, %arg1: i32) -> (i32, i32) {
    %c0_i32 = arith.constant 0 : i32
    %c0_i32_0 = arith.constant 0 : i32
    return %arg0, %c0_i32 : i32, i32
  }
  func.func @transform_3(%arg0: i32, %arg1: i32) -> (i32, i32) {
    %c0_i32 = arith.constant 0 : i32
    %c0_i32_0 = arith.constant 0 : i32
    %c0_i32_1 = arith.constant 0 : i32
    return %c0_i32, %c0_i32_0 : i32, i32
  }
  func.func @transform_4(%arg0: i32, %arg1: i32) -> (i32, i32) {
    %c0_i32 = arith.constant 0 : i32
    %c0_i32_0 = arith.constant 0 : i32
    %c0_i32_1 = arith.constant 0 : i32
    return %c0_i32, %c0_i32_0 : i32, i32
  }
  func.func @transform_5(%arg0: i32, %arg1: i32) -> (i32, i32) {
    %c0_i32 = arith.constant 0 : i32
    %c0_i32_0 = arith.constant 0 : i32
    %c0_i32_1 = arith.constant 0 : i32
    return %c0_i32, %c0_i32_0 : i32, i32
  }
  func.func @transform_6(%arg0: i32, %arg1: i32) -> (i32, i32) {
    %c0_i32 = arith.constant 0 : i32
    %c0_i32_0 = arith.constant 0 : i32
    return %arg0, %c0_i32 : i32, i32
  }
}

module attributes {stable_mosaic.version = 11 : i64} {
  func.func @_head_kernel(%arg0: i32, %arg1: memref<128x128xbf16, #tpu.memory_space<vmem>>, %arg2: memref<128x128xbf16, #tpu.memory_space<vmem>>, %arg3: memref<2x128x128xbf16, #tpu.memory_space<vmem>>, %arg4: memref<1x128xf32, #tpu.memory_space<vmem>>, %arg5: memref<128x128xbf16, #tpu.memory_space<vmem>>, %arg6: memref<1x128xf32, #tpu.memory_space<vmem>>, %arg7: memref<128x128xf32, #tpu.memory_space<vmem>>) attributes {dimension_semantics = [#tpu.dimension_semantics<parallel>], iteration_bounds = array<i64: 1>, scalar_prefetch = 0 : i64, scratch_operands = 0 : i64, tpu.core_type = #tpu.core_type<tc>, window_params = [{transform_indices = @transform_0, window_bounds = array<i64: 128, 128>}, {transform_indices = @transform_1, window_bounds = array<i64: 128, 128>}, {pipeline_mode = #tpu.pipeline_mode<synchronous>, transform_indices = @transform_2, window_bounds = array<i64: 2, 128, 128>}, {pipeline_mode = #tpu.pipeline_mode<synchronous>, transform_indices = @transform_3, window_bounds = array<i64: 1, 128>}, {pipeline_mode = #tpu.pipeline_mode<synchronous>, transform_indices = @transform_4, window_bounds = array<i64: 128, 128>}, {pipeline_mode = #tpu.pipeline_mode<synchronous>, transform_indices = @transform_5, window_bounds = array<i64: 1, 128>}, {transform_indices = @transform_6, window_bounds = array<i64: 128, 128>}]} {
    %c0 = arith.constant 0 : index
    %c0_0 = arith.constant 0 : index
    %0 = vector.load %arg1[%c0, %c0_0] : memref<128x128xbf16, #tpu.memory_space<vmem>>, vector<128x128xbf16>
    %c0_1 = arith.constant 0 : index
    %c0_2 = arith.constant 0 : index
    %c0_3 = arith.constant 0 : index
    %1 = vector.load %arg3[%c0_1, %c0_2, %c0_3] : memref<2x128x128xbf16, #tpu.memory_space<vmem>>, vector<1x128x128xbf16>
    %2 = vector.shape_cast %1 : vector<1x128x128xbf16> to vector<128x128xbf16>
    %cst = arith.constant dense<0.000000e+00> : vector<128x128xf32>
    %3 = tpu.matmul %0, %2, %cst {dimension_numbers = #tpu.dot_dimension_numbers<[1], [0], [0], [1], [0, 0, 1, 1], [], []>} : vector<128x128xbf16>, vector<128x128xbf16>, vector<128x128xf32> -> vector<128x128xf32>
    %c0_4 = arith.constant 0 : index
    %c0_5 = arith.constant 0 : index
    %4 = vector.load %arg2[%c0_4, %c0_5] : memref<128x128xbf16, #tpu.memory_space<vmem>>, vector<128x128xbf16>
    %c1 = arith.constant 1 : index
    %c0_6 = arith.constant 0 : index
    %c0_7 = arith.constant 0 : index
    %5 = vector.load %arg3[%c1, %c0_6, %c0_7] : memref<2x128x128xbf16, #tpu.memory_space<vmem>>, vector<1x128x128xbf16>
    %6 = vector.shape_cast %5 : vector<1x128x128xbf16> to vector<128x128xbf16>
    %cst_8 = arith.constant dense<0.000000e+00> : vector<128x128xf32>
    %7 = tpu.matmul %4, %6, %cst_8 {dimension_numbers = #tpu.dot_dimension_numbers<[1], [0], [0], [1], [0, 0, 1, 1], [], []>} : vector<128x128xbf16>, vector<128x128xbf16>, vector<128x128xf32> -> vector<128x128xf32>
    %8 = arith.addf %3, %7 : vector<128x128xf32>
    %c0_9 = arith.constant 0 : index
    %c0_10 = arith.constant 0 : index
    %9 = vector.load %arg4[%c0_9, %c0_10] : memref<1x128xf32, #tpu.memory_space<vmem>>, vector<1x128xf32>
    %10 = vector.broadcast %9 : vector<1x128xf32> to vector<128x128xf32>
    %11 = arith.addf %8, %10 : vector<128x128xf32>
    %cst_11 = arith.constant 0.000000e+00 : f32
    %12 = vector.broadcast %cst_11 : f32 to vector<128x128xf32>
    %13 = arith.maximumf %11, %12 : vector<128x128xf32>
    %14 = arith.truncf %13 : vector<128x128xf32> to vector<128x128xbf16>
    %c0_12 = arith.constant 0 : index
    %c0_13 = arith.constant 0 : index
    %15 = vector.load %arg5[%c0_12, %c0_13] : memref<128x128xbf16, #tpu.memory_space<vmem>>, vector<128x128xbf16>
    %cst_14 = arith.constant dense<0.000000e+00> : vector<128x128xf32>
    %16 = tpu.matmul %14, %15, %cst_14 {dimension_numbers = #tpu.dot_dimension_numbers<[1], [0], [0], [1], [0, 0, 1, 1], [], []>} : vector<128x128xbf16>, vector<128x128xbf16>, vector<128x128xf32> -> vector<128x128xf32>
    %c0_15 = arith.constant 0 : index
    %c0_16 = arith.constant 0 : index
    %17 = vector.load %arg6[%c0_15, %c0_16] : memref<1x128xf32, #tpu.memory_space<vmem>>, vector<1x128xf32>
    %18 = vector.broadcast %17 : vector<1x128xf32> to vector<128x128xf32>
    %19 = arith.addf %16, %18 : vector<128x128xf32>
    %cst_17 = arith.constant dense<0xFF800000> : vector<128xf32>
    %20 = vector.multi_reduction <maximumf>, %19, %cst_17 [1] : vector<128x128xf32> to vector<128xf32>
    %21 = vector.shape_cast %20 : vector<128xf32> to vector<128x1xf32>
    %22 = vector.broadcast %21 : vector<128x1xf32> to vector<128x128xf32>
    %23 = arith.subf %19, %22 : vector<128x128xf32>
    %24 = math.exp %23 : vector<128x128xf32>
    %cst_18 = arith.constant dense<0.000000e+00> : vector<128xf32>
    %25 = vector.multi_reduction <add>, %24, %cst_18 [1] : vector<128x128xf32> to vector<128xf32>
    %26 = vector.shape_cast %25 : vector<128xf32> to vector<128x1xf32>
    %27 = math.log %26 : vector<128x1xf32>
    %28 = arith.addf %21, %27 : vector<128x1xf32>
    %29 = vector.broadcast %28 : vector<128x1xf32> to vector<128x128xf32>
    %30 = arith.subf %19, %29 : vector<128x128xf32>
    %c0_19 = arith.constant 0 : index
    %c0_20 = arith.constant 0 : index
    %31 = vector.load %arg7[%c0_19, %c0_20] : memref<128x128xf32, #tpu.memory_space<vmem>>, vector<128x128xf32>
    tpu.vector_store %arg7[%c0_19, %c0_20], %30 {strides = array<i32>} : memref<128x128xf32, #tpu.memory_space<vmem>>, vector<128x128xf32>,
    return
  }
  func.func @transform_0(%arg0: i32) -> (i32, i32) {
    %c0_i32 = arith.constant 0 : i32
    %c0_i32_0 = arith.constant 0 : i32
    return %arg0, %c0_i32 : i32, i32
  }
  func.func @transform_1(%arg0: i32) -> (i32, i32) {
    %c0_i32 = arith.constant 0 : i32
    %c0_i32_0 = arith.constant 0 : i32
    return %arg0, %c0_i32 : i32, i32
  }
  func.func @transform_2(%arg0: i32) -> (i32, i32, i32) {
    %c0_i32 = arith.constant 0 : i32
    %c0_i32_0 = arith.constant 0 : i32
    %c0_i32_1 = arith.constant 0 : i32
    %c0_i32_2 = arith.constant 0 : i32
    return %c0_i32, %c0_i32_0, %c0_i32_1 : i32, i32, i32
  }
  func.func @transform_3(%arg0: i32) -> (i32, i32) {
    %c0_i32 = arith.constant 0 : i32
    %c0_i32_0 = arith.constant 0 : i32
    %c0_i32_1 = arith.constant 0 : i32
    return %c0_i32, %c0_i32_0 : i32, i32
  }
  func.func @transform_4(%arg0: i32) -> (i32, i32) {
    %c0_i32 = arith.constant 0 : i32
    %c0_i32_0 = arith.constant 0 : i32
    %c0_i32_1 = arith.constant 0 : i32
    return %c0_i32, %c0_i32_0 : i32, i32
  }
  func.func @transform_5(%arg0: i32) -> (i32, i32) {
    %c0_i32 = arith.constant 0 : i32
    %c0_i32_0 = arith.constant 0 : i32
    %c0_i32_1 = arith.constant 0 : i32
    return %c0_i32, %c0_i32_0 : i32, i32
  }
  func.func @transform_6(%arg0: i32) -> (i32, i32) {
    %c0_i32 = arith.constant 0 : i32
    %c0_i32_0 = arith.constant 0 : i32
    return %arg0, %c0_i32 : i32, i32
  }
}

</mosaic_0001>

<bundles_post_ra>
// kernel: _forward_impl.9
= control target key start
LH: loop header
LB: loop body
LE: loop exit
PB: predicated region body
PF: predicated region fallthrough
CT: control target
= control target key end

     0   :  { %s1561_s2 = inlined_call_operand.vmem [shape: bf16[2,128,128], index: 2, kind: input, shape index: {}]   ;;  %s1562_s1 = inlined_call_operand.vmem [shape: bf16[128,128], index: 1, kind: input, shape index: {}]   ;;  %s1563_s0 = inlined_call_operand.vmem [shape: bf16[128,128], index: 0, kind: input, shape index: {}]   ;;  %s1564_s4 = inlined_call_operand.vmem [shape: bf16[128,128], index: 4, kind: input, shape index: {}]   ;;  %s1565_s3 = inlined_call_operand.vmem [shape: f32[1,128], index: 3, kind: input, shape index: {}]   ;;  %s1566_s5 = inlined_call_operand.vmem [shape: f32[1,128], index: 5, kind: input, shape index: {}]   ;;  %s1567_s6 = inlined_call_operand.vmem [shape: f32[128,128], index: 6, kind: output, shape index: {}]  }
   0x1   :  { %v1104_v0 = vld [vmem:[%s1561_s2 + $0x40] sm:$0xff]   ;;  %v1105_v1 = vld [vmem:[%s1561_s2 + $0x48] sm:$0xff]   ;;  %v1106_v2 = vld [vmem:[%s1561_s2 + $0x50] sm:$0xff]  }
   0x2   :  { %992 = vmatprep.subr.bf16.mxu0 %v1104_v0  ;;  %v1107_v3 = vld [vmem:[%s1561_s2 + $0x58] sm:$0xff]   ;;  %v1112_v4 = vld [vmem:[%s1562_s1] sm:$0xff]   ;;  %v1109_v6 = vld [vmem:[%s1561_s2 + $0x68] sm:$0xff]  }
   0x3   :  { %993 = vmatpush3.bf16.msra.mxu0 %v1104_v0  ;;  %1008 = vmatprep.mubr.bf16.mxu0 %v1112_v4  ;;  %v1108_v5 = vld [vmem:[%s1561_s2 + $0x60] sm:$0xff]   ;;  %v1110_v7 = vld [vmem:[%s1561_s2 + $0x70] sm:$0xff]   ;;  %v1111_v8 = vld [vmem:[%s1561_s2 + $0x78] sm:$0xff]  }
   0x4   :  { %994 = vmatprep.subr.bf16.mxu0 %v1105_v1  ;;  %v1114_v9 = vld [vmem:[%s1561_s2] sm:$0xff]   ;;  %v1113_v10 = vld [vmem:[%s1562_s1 + $0x8] sm:$0xff]   ;;  %v1116_v12 = vld [vmem:[%s1562_s1 + $0x10] sm:$0xff]  }
   0x5   :  { %v1115_v11 = vld [vmem:[%s1561_s2 + $0x8] sm:$0xff]   ;;  %v1136_v13 = vld [vmem:[%s1564_s4] sm:$0xff]   ;;  %v1117_v15 = vld [vmem:[%s1562_s1 + $0x18] sm:$0xff]  }
   0x6   :  { %v1137_v14 = vld [vmem:[%s1564_s4 + $0x8] sm:$0xff]   ;;  %1056 = vmatprep.subr.bf16.mxu1 %v1136_v13  ;;  %v1118_v16 = vld [vmem:[%s1561_s2 + $0x10] sm:$0xff]   ;;  %v1120_v18 = vld [vmem:[%s1562_s1 + $0x20] sm:$0xff]  }
   0x7   :  { %995 = vmatpush3.bf16.msra.mxu0 %v1105_v1  ;;  %1057 = vmatpush3.bf16.msra.mxu1 %v1136_v13  ;;  %v1138_v17 = vld [vmem:[%s1564_s4 + $0x10] sm:$0xff]   ;;  %v1119_v19 = vld [vmem:[%s1561_s2 + $0x18] sm:$0xff]   ;;  %v1122_v21 = vld [vmem:[%s1561_s2 + $0x20] sm:$0xff]  }
   0x8   :  { %996 = vmatprep.subr.bf16.mxu0 %v1106_v2  ;;  %1058 = vmatprep.subr.bf16.mxu1 %v1137_v14  ;;  %v1139_v20 = vld [vmem:[%s1564_s4 + $0x18] sm:$0xff]   ;;  %v1140_v22 = vld [vmem:[%s1564_s4 + $0x20] sm:$0xff]   ;;  %v1121_v23 = vld [vmem:[%s1562_s1 + $0x28] sm:$0xff]  }
   0x9   :  { %v1124_v24 = vld [vmem:[%s1562_s1 + $0x30] sm:$0xff]   ;;  %v1123_v25 = vld [vmem:[%s1561_s2 + $0x28] sm:$0xff]   ;;  %v1125_v28 = vld [vmem:[%s1562_s1 + $0x38] sm:$0xff]  }
   0xa   :  { %v1141_v26 = vld [vmem:[%s1564_s4 + $0x28] sm:$0xff]   ;;  %v1126_v27 = vld [vmem:[%s1561_s2 + $0x30] sm:$0xff]   ;;  %v1128_v29 = vld [vmem:[%s1563_s0] sm:$0xff]  }
   0xb   :  { %997 = vmatpush3.bf16.msra.mxu0 %v1106_v2  ;;  %1059 = vmatpush3.bf16.msra.mxu1 %v1137_v14  ;;  %v1127_v30 = vld [vmem:[%s1561_s2 + $0x38] sm:$0xff]   ;;  %v1129_v31 = vld [vmem:[%s1563_s0 + $0x8] sm:$0xff]   ;;  %v1130_v32 = vld [vmem:[%s1563_s0 + $0x10] sm:$0xff]  }
   0xc   :  { %998 = vmatprep.subr.bf16.mxu0 %v1107_v3  ;;  %1060 = vmatprep.subr.bf16.mxu1 %v1138_v17  ;;  %v1131_v33 = vld [vmem:[%s1563_s0 + $0x18] sm:$0xff]   ;;  %v1132_v34 = vld [vmem:[%s1563_s0 + $0x20] sm:$0xff]   ;;  %v1133_v35 = vld [vmem:[%s1563_s0 + $0x28] sm:$0xff]  }
   0xd   :  { %v1134_v36 = vld [vmem:[%s1563_s0 + $0x30] sm:$0xff]   ;;  %v1135_v37 = vld [vmem:[%s1563_s0 + $0x38] sm:$0xff]   ;;  %v934_v40 = vld [vmem:[%s1565_s3] ss:$0 sm:$0xff] }
   0xe   :  { %v1142_v38 = vld [vmem:[%s1564_s4 + $0x30] sm:$0xff]   ;;  %v1143_v39 = vld [vmem:[%s1564_s4 + $0x38] sm:$0xff]  }
   0xf   :  { %999 = vmatpush3.bf16.msra.mxu0 %v1107_v3  ;;  %1061 = vmatpush3.bf16.msra.mxu1 %v1138_v17 }
  0x10   :  { %1000 = vmatprep.subr.bf16.mxu0 %v1108_v5  ;;  %1062 = vmatprep.subr.bf16.mxu1 %v1139_v20 }
  0x13   :  { %1001 = vmatpush3.bf16.msra.mxu0 %v1108_v5  ;;  %1063 = vmatpush3.bf16.msra.mxu1 %v1139_v20 }
  0x14   :  { %1002 = vmatprep.subr.bf16.mxu0 %v1109_v6  ;;  %1064 = vmatprep.subr.bf16.mxu1 %v1140_v22 }
  0x17   :  { %1003 = vmatpush3.bf16.msra.mxu0 %v1109_v6  ;;  %1065 = vmatpush3.bf16.msra.mxu1 %v1140_v22 }
  0x18   :  { %1004 = vmatprep.subr.bf16.mxu0 %v1110_v7  ;;  %1066 = vmatprep.subr.bf16.mxu1 %v1141_v26 }
  0x1b   :  { %1005 = vmatpush3.bf16.msra.mxu0 %v1110_v7  ;;  %1067 = vmatpush3.bf16.msra.mxu1 %v1141_v26 }
  0x1c   :  { %1006 = vmatprep.subr.bf16.mxu0 %v1111_v8  ;;  %1068 = vmatprep.subr.bf16.mxu1 %v1142_v38 }
  0x1f   :  { %1007 = vmatpush3.bf16.msra.mxu0 %v1111_v8  ;;  %1069 = vmatpush3.bf16.msra.mxu1 %v1142_v38 }
  0x20   :  { %1024 = vmatprep.subr.bf16.mxu0 %v1114_v9  ;;  %1070 = vmatprep.subr.bf16.mxu1 %v1143_v39 }
  0x22   :  { %1009 = vmatmul.mubr.bf16.vlgmr.msra.gmra.mrb[0].mxu0 %v1113_v10 }
  0x23   :  { %1025 = vmatpush3.bf16.msra.mxu0 %v1114_v9  ;;  %1012 = vmatprep.mubr.bf16.mxu0 %v1116_v12 }
  0x24   :  { %1026 = vmatprep.subr.bf16.mxu0 %v1115_v11  ;;  %1071 = vmatpush3.bf16.msra.mxu1 %v1143_v39 }
  0x27   :  { %1027 = vmatpush3.bf16.msra.mxu0 %v1115_v11 }
  0x28   :  { %1028 = vmatprep.subr.bf16.mxu0 %v1118_v16 }
  0x2a   :  { %1013 = vmatmul.mubr.bf16.gmra.mrb[4].mxu0 %v1117_v15 }
  0x2b   :  { %1029 = vmatpush3.bf16.msra.mxu0 %v1118_v16  ;;  %1016 = vmatprep.mubr.bf16.mxu0 %v1120_v18 }
  0x2c   :  { %1030 = vmatprep.subr.bf16.mxu0 %v1119_v19 }
  0x2f   :  { %1031 = vmatpush3.bf16.msra.mxu0 %v1119_v19 }
  0x30   :  { %1032 = vmatprep.subr.bf16.mxu0 %v1122_v21 }
  0x32   :  { %1017 = vmatmul.mubr.bf16.gmra.mrb[8].mxu0 %v1121_v23 }
  0x33   :  { %1033 = vmatpush3.bf16.msra.mxu0 %v1122_v21  ;;  %1020 = vmatprep.mubr.bf16.mxu0 %v1124_v24 }
  0x34   :  { %1034 = vmatprep.subr.bf16.mxu0 %v1123_v25 }
  0x37   :  { %1035 = vmatpush3.bf16.msra.mxu0 %v1123_v25 }
  0x38   :  { %1036 = vmatprep.subr.bf16.mxu0 %v1126_v27 }
  0x3a   :  { %1021 = vmatmul.mubr.bf16.gmra.mrb[12].mxu0 %v1125_v28 }
  0x3b   :  { %1037 = vmatpush3.bf16.msra.mxu0 %v1126_v27  ;;  %1040 = vmatprep.mubr.bf16.mxu0 %v1128_v29 }
  0x3c   :  { %1038 = vmatprep.subr.bf16.mxu0 %v1127_v30 }
  0x3f   :  { %1039 = vmatpush3.bf16.msra.mxu0 %v1127_v30 }
  0x42   :  { %1041 = vmatmul.mubr.bf16.vlgmr.msra.gmra.mrb[0].mxu0 %v1129_v31 }
  0x43   :  { %1044 = vmatprep.mubr.bf16.mxu0 %v1130_v32 }
  0x4a   :  { %1045 = vmatmul.mubr.bf16.gmra.mrb[4].mxu0 %v1131_v33  ;;  %v935_v33 = vld [vmem:[%s1566_s5] ss:$0 sm:$0xff] }
  0x4b   :  { %1048 = vmatprep.mubr.bf16.mxu0 %v1132_v34 }
  0x52   :  { %1049 = vmatmul.mubr.bf16.gmra.mrb[8].mxu0 %v1133_v35 }
  0x53   :  { %1052 = vmatprep.mubr.bf16.mxu0 %v1134_v36 }
  0x5a   :  { %1053 = vmatmul.mubr.bf16.gmra.mrb[12].mxu0 %v1135_v37 }
 0x115   :  { %v1042_v41 = vpop.f32.mrb[0].mxu0 }
 0x116   :  { %v484_v42 = vadd.f32 %v1042_v41, %v934_v40  ;;  %v412_v43 = vpop.f32.mrb[1].mxu0 }
 0x117   :  { %v482_v44 = vadd.f32 %v934_v40, %v412_v43  ;;  %v1043_v45 = vpop.f32.mrb[2].mxu0 }
 0x118   :  { %v485_v46 = vadd.f32 %v1043_v45, %v934_v40  ;;  %v415_v47 = vpop.f32.mrb[3].mxu0  ;;  %v500_v49 = vmax.f32 %v484_v42, 0.0 }
 0x119   :  { %v483_v48 = vadd.f32 %v934_v40, %v415_v47  ;;  %v498_v51 = vmax.f32 %v482_v44, 0.0 }
 0x11a   :  { %v501_v50 = vmax.f32 %v485_v46, 0.0 }
 0x11b   :  { %v499_v52 = vmax.f32 %v483_v48, 0.0 }
 0x11c   :  { %v515_v53 = vpack.c.bf16 %v501_v50, %v500_v49 }
 0x11d   :  { %v1046_v54 = vpop.f32.mrb[4].mxu0  ;;  %v514_v55 = vpack.c.bf16 %v499_v52, %v498_v51 }
 0x11e   :  { %v488_v56 = vadd.f32 %v1046_v54, %v934_v40  ;;  %v428_v57 = vpop.f32.mrb[5].mxu0 }
 0x11f   :  { %v486_v58 = vadd.f32 %v934_v40, %v428_v57  ;;  %v1047_v59 = vpop.f32.mrb[6].mxu0  ;;  %1072 = vmatprep.mubr.bf16.mxu1 %v514_v55 }
 0x120   :  { %v489_v60 = vadd.f32 %v1047_v59, %v934_v40  ;;  %v431_v61 = vpop.f32.mrb[7].mxu0  ;;  %1073 = vmatmul.mubr.bf16.vlgmr.msra.gmra.mrb[0].mxu1 %v515_v53  ;;  %v504_v63 = vmax.f32 %v488_v56, 0.0 }
 0x121   :  { %v487_v62 = vadd.f32 %v934_v40, %v431_v61  ;;  %v502_v1 = vmax.f32 %v486_v58, 0.0 }
 0x122   :  { %v505_v0 = vmax.f32 %v489_v60, 0.0 }
 0x123   :  { %v503_v2 = vmax.f32 %v487_v62, 0.0 }
 0x124   :  { %v517_v3 = vpack.c.bf16 %v505_v0, %v504_v63 }
 0x125   :  { %v516_v4 = vpack.c.bf16 %v503_v2, %v502_v1  ;;  %v1050_v5 = vpop.f32.mrb[8].mxu0 }
 0x126   :  { %v492_v6 = vadd.f32 %v1050_v5, %v934_v40  ;;  %v444_v7 = vpop.f32.mrb[9].mxu0 }
 0x127   :  { %v490_v8 = vadd.f32 %v934_v40, %v444_v7  ;;  %v1051_v9 = vpop.f32.mrb[10].mxu0  ;;  %1076 = vmatprep.mubr.bf16.mxu1 %v516_v4 }
 0x128   :  { %v493_v10 = vadd.f32 %v1051_v9, %v934_v40  ;;  %v447_v11 = vpop.f32.mrb[11].mxu0  ;;  %1077 = vmatmul.mubr.bf16.gmra.mrb[4].mxu1 %v517_v3  ;;  %v508_v13 = vmax.f32 %v492_v6, 0.0 }
 0x129   :  { %v491_v12 = vadd.f32 %v934_v40, %v447_v11  ;;  %v506_v15 = vmax.f32 %v490_v8, 0.0 }
 0x12a   :  { %v509_v14 = vmax.f32 %v493_v10, 0.0 }
 0x12b   :  { %v507_v16 = vmax.f32 %v491_v12, 0.0 }
 0x12c   :  { %v519_v17 = vpack.c.bf16 %v509_v14, %v508_v13 }
 0x12d   :  { %v518_v18 = vpack.c.bf16 %v507_v16, %v506_v15  ;;  %v1054_v19 = vpop.f32.mrb[12].mxu0 }
 0x12e   :  { %v496_v20 = vadd.f32 %v1054_v19, %v934_v40  ;;  %v460_v21 = vpop.f32.mrb[13].mxu0 }
 0x12f   :  { %v494_v22 = vadd.f32 %v934_v40, %v460_v21  ;;  %v1055_v23 = vpop.f32.mrb[14].mxu0  ;;  %1080 = vmatprep.mubr.bf16.mxu1 %v518_v18 }
 0x130   :  { %v497_v24 = vadd.f32 %v1055_v23, %v934_v40  ;;  %v463_v25 = vpop.f32.mrb[15].mxu0  ;;  %1081 = vmatmul.mubr.bf16.gmra.mrb[8].mxu1 %v519_v17  ;;  %v512_v27 = vmax.f32 %v496_v20, 0.0 }
 0x131   :  { %v495_v26 = vadd.f32 %v934_v40, %v463_v25  ;;  %v510_v29 = vmax.f32 %v494_v22, 0.0 }
 0x132   :  { %v513_v28 = vmax.f32 %v497_v24, 0.0 }
 0x133   :  { %v511_v30 = vmax.f32 %v495_v26, 0.0 }
 0x134   :  { %v521_v31 = vpack.c.bf16 %v513_v28, %v512_v27 }
 0x135   :  { %v520_v32 = vpack.c.bf16 %v511_v30, %v510_v29 }
 0x137   :  { %1084 = vmatprep.mubr.bf16.mxu1 %v520_v32 }
 0x138   :  { %1085 = vmatmul.mubr.bf16.gmra.mrb[12].mxu1 %v521_v31 }
 0x1f3   :  { %v1074_v34 = vpop.f32.mrb[0].mxu1 }
 0x1f4   :  { %v1369_v35 = vadd.f32 %v1074_v34, %v935_v33  ;;  %v627_v36 = vpop.f32.mrb[1].mxu1 }
 0x1f5   :  { %v1371_v37 = vadd.f32 %v935_v33, %v627_v36  ;;  %v1075_v38 = vpop.f32.mrb[2].mxu1 }
 0x1f6   :  { %694 = vmax.xlane.f32.xlu1 %v1369_v35  ;;  %v630_v39 = vpop.f32.mrb[3].mxu1  ;;  %v1375_v40 = vadd.f32 %v1075_v38, %v935_v33 }
 0x1f7   :  { %690 = vmax.xlane.f32.xlu0 %v1371_v37  ;;  %v1377_v41 = vadd.f32 %v935_v33, %v630_v39 }
 0x1fa   :  { %696 = vmax.xlane.f32.xlu1 %v1375_v40 }
 0x1fb   :  { %692 = vmax.xlane.f32.xlu0 %v1377_v41  ;;  %v1078_v42 = vpop.f32.mrb[4].mxu1 }
 0x1fc   :  { %v1381_v43 = vadd.f32 %v1078_v42, %v935_v33  ;;  %v643_v44 = vpop.f32.mrb[5].mxu1 }
 0x1fd   :  { %v1079_v45 = vpop.f32.mrb[6].mxu1  ;;  %v1387_v48 = vadd.f32 %v935_v33, %v643_v44 }
 0x1fe   :  { %v1383_v46 = vadd.f32 %v1079_v45, %v935_v33  ;;  %v646_v47 = vpop.f32.mrb[7].mxu1 }
 0x1ff   :  { %702 = vmax.xlane.f32.xlu0 %v1381_v43  ;;  %v1389_v49 = vadd.f32 %v935_v33, %v646_v47 }
 0x200   :  { %704 = vmax.xlane.f32.xlu1 %v1383_v46 }
 0x203   :  { %698 = vmax.xlane.f32.xlu0 %v1387_v48  ;;  %v1082_v50 = vpop.f32.mrb[8].mxu1 }
 0x204   :  { %v1392_v51 = vadd.f32 %v1082_v50, %v935_v33  ;;  %700 = vmax.xlane.f32.xlu1 %v1389_v49  ;;  %v659_v52 = vpop.f32.mrb[9].mxu1 }
 0x205   :  { %v1083_v53 = vpop.f32.mrb[10].mxu1  ;;  %v1399_v56 = vadd.f32 %v935_v33, %v659_v52 }
 0x206   :  { %v1395_v54 = vadd.f32 %v1083_v53, %v935_v33  ;;  %v662_v55 = vpop.f32.mrb[11].mxu1 }
 0x207   :  { %710 = vmax.xlane.f32.xlu0 %v1392_v51  ;;  %v1401_v57 = vadd.f32 %v935_v33, %v662_v55 }
 0x208   :  { %712 = vmax.xlane.f32.xlu1 %v1395_v54 }
 0x20b   :  { %706 = vmax.xlane.f32.xlu0 %v1399_v56  ;;  %v1086_v58 = vpop.f32.mrb[12].mxu1 }
 0x20c   :  { %708 = vmax.xlane.f32.xlu1 %v1401_v57  ;;  %v675_v59 = vpop.f32.mrb[13].mxu1  ;;  %v1410_v0 = vadd.f32 %v1086_v58, %v935_v33 }
 0x20d   :  { %v1405_v60 = vadd.f32 %v935_v33, %v675_v59  ;;  %v1087_v61 = vpop.f32.mrb[14].mxu1 }
 0x20e   :  { %v678_v62 = vpop.f32.mrb[15].mxu1  ;;  %v1413_v1 = vadd.f32 %v1087_v61, %v935_v33 }
 0x20f   :  { %v1407_v63 = vadd.f32 %v935_v33, %v678_v62  ;;  %714 = vmax.xlane.f32.xlu0 %v1405_v60 }
 0x211   :  { %716 = vmax.xlane.f32.xlu1 %v1407_v63 }
 0x213   :  { %718 = vmax.xlane.f32.xlu0 %v1410_v0 }
 0x215   :  { %720 = vmax.xlane.f32.xlu1 %v1413_v1 }
 0x283   :  { %v1417_v2 = vpop.xlane.xlu1 %694 }
 0x284   :  { %v724_v3 = vsub.f32 %v1369_v35, %v1417_v2  ;;  %v1421_v4 = vpop.xlane.xlu0 %690 }
 0x285   :  { %v722_v5 = vsub.f32 %v1371_v37, %v1421_v4 }
 0x286   :  { %v742_v6 = vmul.f32 1.442695, %v724_v3 }
 0x287   :  { %v738_v7 = vmul.f32 1.442695, %v722_v5  ;;  %v1425_v8 = vpop.xlane.xlu1 %696 }
 0x288   :  { %1144 = vpow2.f32 %v742_v6  ;;  %v725_v9 = vsub.f32 %v1375_v40, %v1425_v8  ;;  %v1429_v10 = vpop.xlane.xlu0 %692 }
 0x289   :  { %v723_v11 = vsub.f32 %v1377_v41, %v1429_v10  ;;  %1146 = vpow2.f32 %v738_v7 }
 0x28a   :  { %v744_v12 = vmul.f32 1.442695, %v725_v9 }
 0x28b   :  { %v740_v13 = vmul.f32 1.442695, %v723_v11 }
 0x28c   :  { %1148 = vpow2.f32 %v744_v12  ;;  %v1433_v14 = vpop.xlane.xlu0 %702 }
 0x28d   :  { %v728_v15 = vsub.f32 %v1381_v43, %v1433_v14  ;;  %v1437_v16 = vpop.xlane.xlu1 %704  ;;  %1150 = vpow2.f32 %v740_v13 }
 0x28e   :  { %v729_v17 = vsub.f32 %v1383_v46, %v1437_v16 }
 0x28f   :  { %v750_v18 = vmul.f32 1.442695, %v728_v15 }
 0x290   :  { %v752_v19 = vmul.f32 1.442695, %v729_v17  ;;  %v1441_v20 = vpop.xlane.xlu0 %698 }
 0x291   :  { %1152 = vpow2.f32 %v750_v18  ;;  %v726_v21 = vsub.f32 %v1387_v48, %v1441_v20  ;;  %v1445_v22 = vpop.xlane.xlu1 %700 }
 0x292   :  { %v1145_v23 = vpop.eup %1144  ;;  %v727_v24 = vsub.f32 %v1389_v49, %v1445_v22  ;;  %1154 = vpow2.f32 %v752_v19 }
 0x293   :  { %v746_v25 = vmul.f32 1.442695, %v726_v21  ;;  %774 = vadd.xlane.f32.xlu0 %v1145_v23  ;;  %v1147_v28 = vpop.eup %1146 }
 0x294   :  { %v748_v26 = vmul.f32 1.442695, %v727_v24  ;;  %v1449_v27 = vpop.xlane.xlu0 %710 }
 0x295   :  { %1156 = vpow2.f32 %v746_v25  ;;  %v732_v29 = vsub.f32 %v1392_v51, %v1449_v27  ;;  %v1453_v30 = vpop.xlane.xlu1 %712 }
 0x296   :  { %v1149_v31 = vpop.eup %1148  ;;  %v733_v32 = vsub.f32 %v1395_v54, %v1453_v30  ;;  %1158 = vpow2.f32 %v748_v26 }
 0x297   :  { %v758_v33 = vmul.f32 1.442695, %v732_v29  ;;  %776 = vadd.xlane.f32.xlu1 %v1149_v31  ;;  %770 = vadd.xlane.f32.xlu0 %v1147_v28  ;;  %v1151_v42 = vpop.eup %1150 }
 0x298   :  { %v760_v34 = vmul.f32 1.442695, %v733_v32  ;;  %v1457_v36 = vpop.xlane.xlu0 %706 }
 0x299   :  { %1160 = vpow2.f32 %v758_v33  ;;  %v730_v38 = vsub.f32 %v1399_v56, %v1457_v36  ;;  %v1461_v39 = vpop.xlane.xlu1 %708 }
 0x29a   :  { %v731_v44 = vsub.f32 %v1401_v57, %v1461_v39  ;;  %1162 = vpow2.f32 %v760_v34 }
 0x29b   :  { %v1153_v45 = vpop.eup %1152  ;;  %v754_v47 = vmul.f32 1.442695, %v730_v38  ;;  %772 = vadd.xlane.f32.xlu1 %v1151_v42 }
 0x29c   :  { %v756_v50 = vmul.f32 1.442695, %v731_v44  ;;  %782 = vadd.xlane.f32.xlu0 %v1153_v45  ;;  %v1465_v52 = vpop.xlane.xlu0 %714  ;;  %v1155_v55 = vpop.eup %1154 }
 0x29d   :  { %1164 = vpow2.f32 %v754_v47  ;;  %v734_v53 = vsub.f32 %v1405_v60, %v1465_v52 }
 0x29e   :  { %v1469_v58 = vpop.xlane.xlu1 %716  ;;  %1166 = vpow2.f32 %v756_v50 }
 0x29f   :  { %v1157_v59 = vpop.eup %1156  ;;  %v762_v61 = vmul.f32 1.442695, %v734_v53  ;;  %v735_v62 = vsub.f32 %v1407_v63, %v1469_v58  ;;  %784 = vadd.xlane.f32.xlu1 %v1155_v55 }
 0x2a0   :  { %778 = vadd.xlane.f32.xlu0 %v1157_v59  ;;  %v1473_v3 = vpop.xlane.xlu0 %718  ;;  %v1159_v7 = vpop.eup %1158 }
 0x2a1   :  { %1168 = vpow2.f32 %v762_v61  ;;  %v764_v5 = vmul.f32 1.442695, %v735_v62  ;;  %v736_v6 = vsub.f32 %v1410_v0, %v1473_v3 }
 0x2a2   :  { %v1477_v9 = vpop.xlane.xlu1 %720 }
 0x2a3   :  { %v1161_v11 = vpop.eup %1160  ;;  %1170 = vpow2.f32 %v764_v5  ;;  %v766_v12 = vmul.f32 1.442695, %v736_v6  ;;  %v737_v13 = vsub.f32 %v1413_v1, %v1477_v9  ;;  %780 = vadd.xlane.f32.xlu1 %v1159_v7 }
 0x2a4   :  { %790 = vadd.xlane.f32.xlu0 %v1161_v11  ;;  %v1163_v17 = vpop.eup %1162 }
 0x2a5   :  { %1172 = vpow2.f32 %v766_v12  ;;  %v768_v15 = vmul.f32 1.442695, %v737_v13 }
 0x2a7   :  { %v1165_v18 = vpop.eup %1164  ;;  %1174 = vpow2.f32 %v768_v15  ;;  %792 = vadd.xlane.f32.xlu1 %v1163_v17 }
 0x2a8   :  { %786 = vadd.xlane.f32.xlu0 %v1165_v18  ;;  %v1167_v19 = vpop.eup %1166 }
 0x2ab   :  { %v1169_v21 = vpop.eup %1168  ;;  %788 = vadd.xlane.f32.xlu1 %v1167_v19 }
 0x2ac   :  { %794 = vadd.xlane.f32.xlu0 %v1169_v21 }
 0x2ad   :  { %v1171_v23 = vpop.eup %1170 }
 0x2af   :  { %v1173_v24 = vpop.eup %1172  ;;  %796 = vadd.xlane.f32.xlu1 %v1171_v23 }
 0x2b0   :  { %798 = vadd.xlane.f32.xlu0 %v1173_v24 }
 0x2b1   :  { %v1175_v25 = vpop.eup %1174 }
 0x2b3   :  { %800 = vadd.xlane.f32.xlu1 %v1175_v25 }
 0x320   :  { %v775_v26 = vpop.xlane.xlu0 %774 }
 0x321   :  { %1176 = vlog2.f32 %v775_v26 }
 0x324   :  { %v777_v28 = vpop.xlane.xlu1 %776  ;;  %v771_v29 = vpop.xlane.xlu0 %770 }
 0x325   :  { %1178 = vlog2.f32 %v777_v28 }
 0x326   :  { %1180 = vlog2.f32 %v771_v29 }
 0x328   :  { %v773_v31 = vpop.xlane.xlu1 %772 }
 0x329   :  { %1182 = vlog2.f32 %v773_v31  ;;  %v783_v32 = vpop.xlane.xlu0 %782 }
 0x32a   :  { %1184 = vlog2.f32 %v783_v32 }
 0x32b   :  { %v1177_v33 = vpop.eup %1176 }
 0x32c   :  { %v807_v34 = vmul.f32 0.6931472, %v1177_v33  ;;  %v785_v38 = vpop.xlane.xlu1 %784 }
 0x32d   :  { %1186 = vlog2.f32 %v785_v38  ;;  %v779_v42 = vpop.xlane.xlu0 %778 }
 0x32e   :  { %v836_v44 = vadd.f32 %v807_v34, %v1417_v2  ;;  %1188 = vlog2.f32 %v779_v42 }
 0x32f   :  { %v1179_v45 = vpop.eup %1178 }
 0x330   :  { %v1181_v47 = vpop.eup %1180  ;;  %v852_v50 = vsub.f32 %v1369_v35, %v836_v44  ;;  %v809_v53 = vmul.f32 0.6931472, %v1179_v45  ;;  %v781_v55 = vpop.xlane.xlu1 %780 }
 0x331   :  { %v803_v59 = vmul.f32 0.6931472, %v1181_v47  ;;  %1190 = vlog2.f32 %v781_v55  ;;  %v791_v61 = vpop.xlane.xlu0 %790 }
 0x332   :  { %868 = vst [vmem:[%s1567_s6 + $0x10] sm:$0xff] %v852_v50  ;;  %v837_v62 = vadd.f32 %v809_v53, %v1425_v8  ;;  %1192 = vlog2.f32 %v791_v61 }
 0x333   :  { %v1183_v5 = vpop.eup %1182  ;;  %v834_v2 = vadd.f32 %v803_v59, %v1421_v4 }
 0x334   :  { %v1185_v6 = vpop.eup %1184  ;;  %v853_v7 = vsub.f32 %v1375_v40, %v837_v62  ;;  %v805_v11 = vmul.f32 0.6931472, %v1183_v5  ;;  %v793_v35 = vpop.xlane.xlu1 %792 }
 0x335   :  { %v850_v12 = vsub.f32 %v1371_v37, %v834_v2  ;;  %v815_v13 = vmul.f32 0.6931472, %v1185_v6  ;;  %1194 = vlog2.f32 %v793_v35  ;;  %v787_v15 = vpop.xlane.xlu0 %786 }
 0x336   :  { %869 = vst [vmem:[%s1567_s6 + $0x18] sm:$0xff] %v853_v7  ;;  %v835_v8 = vadd.f32 %v805_v11, %v1429_v10  ;;  %1196 = vlog2.f32 %v787_v15 }
 0x337   :  { %v1187_v17 = vpop.eup %1186  ;;  %866 = vst [vmem:[%s1567_s6] sm:$0xff] %v850_v12  ;;  %v840_v40 = vadd.f32 %v815_v13, %v1433_v14 }
 0x338   :  { %v1189_v4 = vpop.eup %1188  ;;  %v851_v37 = vsub.f32 %v1377_v41, %v835_v8  ;;  %v817_v18 = vmul.f32 0.6931472, %v1187_v17  ;;  %v789_v19 = vpop.xlane.xlu1 %788 }
 0x339   :  { %v856_v21 = vsub.f32 %v1381_v43, %v840_v40  ;;  %v811_v23 = vmul.f32 0.6931472, %v1189_v4  ;;  %1198 = vlog2.f32 %v789_v19  ;;  %v795_v24 = vpop.xlane.xlu0 %794 }
 0x33a   :  { %867 = vst [vmem:[%s1567_s6 + $0x8] sm:$0xff] %v851_v37  ;;  %v841_v10 = vadd.f32 %v817_v18, %v1437_v16  ;;  %1200 = vlog2.f32 %v795_v24 }
 0x33b   :  { %v1191_v25 = vpop.eup %1190  ;;  %872 = vst [vmem:[%s1567_s6 + $0x30] sm:$0xff] %v856_v21  ;;  %v838_v41 = vadd.f32 %v811_v23, %v1441_v20 }
 0x33c   :  { %v1193_v14 = vpop.eup %1192  ;;  %v857_v43 = vsub.f32 %v1383_v46, %v841_v10  ;;  %v813_v26 = vmul.f32 0.6931472, %v1191_v25  ;;  %v797_v28 = vpop.xlane.xlu1 %796 }
 0x33d   :  { %v854_v29 = vsub.f32 %v1387_v48, %v838_v41  ;;  %v823_v31 = vmul.f32 0.6931472, %v1193_v14  ;;  %1202 = vlog2.f32 %v797_v28  ;;  %v799_v32 = vpop.xlane.xlu0 %798 }
 0x33e   :  { %873 = vst [vmem:[%s1567_s6 + $0x38] sm:$0xff] %v857_v43  ;;  %v839_v16 = vadd.f32 %v813_v26, %v1445_v22  ;;  %1204 = vlog2.f32 %v799_v32 }
 0x33f   :  { %v1195_v33 = vpop.eup %1194  ;;  %870 = vst [vmem:[%s1567_s6 + $0x20] sm:$0xff] %v854_v29  ;;  %v844_v46 = vadd.f32 %v823_v31, %v1449_v27 }
 0x340   :  { %v1197_v20 = vpop.eup %1196  ;;  %v855_v48 = vsub.f32 %v1389_v49, %v839_v16  ;;  %v825_v34 = vmul.f32 0.6931472, %v1195_v33  ;;  %v801_v38 = vpop.xlane.xlu1 %800 }
 0x341   :  { %v860_v42 = vsub.f32 %v1392_v51, %v844_v46  ;;  %v819_v44 = vmul.f32 0.6931472, %v1197_v20  ;;  %1206 = vlog2.f32 %v801_v38 }
 0x342   :  { %871 = vst [vmem:[%s1567_s6 + $0x28] sm:$0xff] %v855_v48  ;;  %v845_v22 = vadd.f32 %v825_v34, %v1453_v30 }
 0x343   :  { %v1199_v45 = vpop.eup %1198  ;;  %876 = vst [vmem:[%s1567_s6 + $0x50] sm:$0xff] %v860_v42  ;;  %v842_v27 = vadd.f32 %v819_v44, %v1457_v36 }
 0x344   :  { %v1201_v49 = vpop.eup %1200  ;;  %v861_v47 = vsub.f32 %v1395_v54, %v845_v22  ;;  %v821_v50 = vmul.f32 0.6931472, %v1199_v45 }
 0x345   :  { %v858_v51 = vsub.f32 %v1399_v56, %v842_v27  ;;  %v827_v53 = vmul.f32 0.6931472, %v1201_v49 }
 0x346   :  { %877 = vst [vmem:[%s1567_s6 + $0x58] sm:$0xff] %v861_v47  ;;  %v843_v30 = vadd.f32 %v821_v50, %v1461_v39 }
 0x347   :  { %v1203_v55 = vpop.eup %1202  ;;  %874 = vst [vmem:[%s1567_s6 + $0x40] sm:$0xff] %v858_v51  ;;  %v846_v36 = vadd.f32 %v827_v53, %v1465_v52 }
 0x348   :  { %v1205_v59 = vpop.eup %1204  ;;  %v859_v54 = vsub.f32 %v1401_v57, %v843_v30  ;;  %v829_v61 = vmul.f32 0.6931472, %v1203_v55 }
 0x349   :  { %v862_v56 = vsub.f32 %v1405_v60, %v846_v36  ;;  %v831_v62 = vmul.f32 0.6931472, %v1205_v59 }
 0x34a   :  { %875 = vst [vmem:[%s1567_s6 + $0x48] sm:$0xff] %v859_v54  ;;  %v847_v39 = vadd.f32 %v829_v61, %v1469_v58 }
 0x34b   :  { %v1207_v5 = vpop.eup %1206  ;;  %878 = vst [vmem:[%s1567_s6 + $0x60] sm:$0xff] %v862_v56  ;;  %v848_v52 = vadd.f32 %v831_v62, %v1473_v3 }
 0x34c   :  { %v863_v2 = vsub.f32 %v1407_v63, %v847_v39  ;;  %v833_v57 = vmul.f32 0.6931472, %v1207_v5 }
 0x34d   :  { %v864_v6 = vsub.f32 %v1410_v0, %v848_v52 }
 0x34e   :  { %879 = vst [vmem:[%s1567_s6 + $0x68] sm:$0xff] %v863_v2  ;;  %v849_v60 = vadd.f32 %v833_v57, %v1477_v9 }
 0x34f   :  { %880 = vst [vmem:[%s1567_s6 + $0x70] sm:$0xff] %v864_v6 }
 0x350   :  { %v865_v58 = vsub.f32 %v1413_v1, %v849_v60 }
 0x352   :  { %881 = vst [vmem:[%s1567_s6 + $0x78] sm:$0xff] %v865_v58 }

// kernel: _forward_impl.7
= control target key start
LH: loop header
LB: loop body
LE: loop exit
PB: predicated region body
PF: predicated region fallthrough
CT: control target
= control target key end

     0   :  { %s1453_s1 = inlined_call_operand.vmem [shape: bf16[128,128], index: 1, kind: input, shape index: {}, may-alias: {1,2}]   ;;  %s1454_s0 = inlined_call_operand.vmem [shape: bf16[128,128], index: 0, kind: input, shape index: {}]   ;;  %s1455_s3 = inlined_call_operand.vmem [shape: bf16[128,128], index: 3, kind: input, shape index: {}]   ;;  %s1456_s4 = inlined_call_operand.vmem [shape: bf16[128,128], index: 4, kind: input, shape index: {}]   ;;  %s1457_s2 = inlined_call_operand.vmem [shape: bf16[128,128], index: 2, kind: input, shape index: {}, may-alias: {1,2}]   ;;  %s1458_s5 = inlined_call_operand.vmem [shape: f32[1,128], index: 5, kind: input, shape index: {}]   ;;  %s1459_s6 = inlined_call_operand.vmem [shape: bf16[128,128], index: 6, kind: output, shape index: {}]  }
   0x1   :  { %v1165_v0 = vld [vmem:[%s1453_s1] sm:$0xff]   ;;  %v1166_v1 = vld [vmem:[%s1453_s1 + $0x8] sm:$0xff]   ;;  %v1167_v2 = vld [vmem:[%s1453_s1 + $0x10] sm:$0xff]  }
   0x2   :  { %1037 = vmatprep.subr.bf16.mxu0 %v1165_v0  ;;  %v1168_v3 = vld [vmem:[%s1453_s1 + $0x18] sm:$0xff]   ;;  %v1173_v4 = vld [vmem:[%s1454_s0] sm:$0xff]   ;;  %v1170_v6 = vld [vmem:[%s1453_s1 + $0x28] sm:$0xff]  }
   0x3   :  { %1038 = vmatpush3.bf16.msra.mxu0 %v1165_v0  ;;  %1053 = vmatprep.mubr.bf16.mxu0 %v1173_v4  ;;  %v1169_v5 = vld [vmem:[%s1453_s1 + $0x20] sm:$0xff]   ;;  %v1183_v8 = vld [vmem:[%s1455_s3 + $0x8] sm:$0xff]   ;;  %v1171_v9 = vld [vmem:[%s1453_s1 + $0x30] sm:$0xff]  }
   0x4   :  { %1039 = vmatprep.subr.bf16.mxu0 %v1166_v1  ;;  %v1181_v7 = vld [vmem:[%s1455_s3] sm:$0xff]   ;;  %v1185_v10 = vld [vmem:[%s1455_s3 + $0x10] sm:$0xff]   ;;  %v1172_v11 = vld [vmem:[%s1453_s1 + $0x38] sm:$0xff]  }
   0x5   :  { %1069 = vmatprep.subr.bf16.mxu1 %v1181_v7  ;;  %v1187_v12 = vld [vmem:[%s1455_s3 + $0x18] sm:$0xff]   ;;  %v1282_v13 = vld [vmem:[%s1456_s4] sm:$0xff]   ;;  %v1174_v15 = vld [vmem:[%s1454_s0 + $0x8] sm:$0xff]  }
   0x6   :  { %1070 = vmatpush3.bf16.msra.mxu1 %v1181_v7  ;;  %v1189_v14 = vld [vmem:[%s1455_s3 + $0x20] sm:$0xff]   ;;  %v1175_v16 = vld [vmem:[%s1454_s0 + $0x10] sm:$0xff]   ;;  %v1297_v17 = vld [vmem:[%s1456_s4 + $0x8] sm:$0xff]  }
   0x7   :  { %1040 = vmatpush3.bf16.msra.mxu0 %v1166_v1  ;;  %1071 = vmatprep.subr.bf16.mxu1 %v1183_v8  ;;  %v1191_v18 = vld [vmem:[%s1455_s3 + $0x28] sm:$0xff]   ;;  %v1307_v19 = vld [vmem:[%s1456_s4 + $0x10] sm:$0xff]   ;;  %v1176_v21 = vld [vmem:[%s1454_s0 + $0x18] sm:$0xff]  }
   0x8   :  { %1041 = vmatprep.subr.bf16.mxu0 %v1167_v2  ;;  %v1193_v20 = vld [vmem:[%s1455_s3 + $0x30] sm:$0xff]   ;;  %v1177_v22 = vld [vmem:[%s1454_s0 + $0x20] sm:$0xff]   ;;  %v1323_v23 = vld [vmem:[%s1456_s4 + $0x18] sm:$0xff]  }
   0x9   :  { %v1330_v24 = vld [vmem:[%s1456_s4 + $0x20] sm:$0xff]   ;;  %v1178_v25 = vld [vmem:[%s1454_s0 + $0x28] sm:$0xff]   ;;  %v1179_v26 = vld [vmem:[%s1454_s0 + $0x30] sm:$0xff]  }
   0xa   :  { %1072 = vmatpush3.bf16.msra.mxu1 %v1183_v8  ;;  %v1343_v27 = vld [vmem:[%s1456_s4 + $0x28] sm:$0xff]   ;;  %v1350_v28 = vld [vmem:[%s1456_s4 + $0x30] sm:$0xff]   ;;  %v1180_v29 = vld [vmem:[%s1454_s0 + $0x38] sm:$0xff]  }
   0xb   :  { %1042 = vmatpush3.bf16.msra.mxu0 %v1167_v2  ;;  %1073 = vmatprep.subr.bf16.mxu1 %v1185_v10  ;;  %v1195_v30 = vld [vmem:[%s1455_s3 + $0x38] sm:$0xff]   ;;  %v1197_v32 = vld [vmem:[%s1457_s2] sm:$0xff]   ;;  %v1198_v33 = vld [vmem:[%s1457_s2 + $0x8] sm:$0xff]  }
   0xc   :  { %1043 = vmatprep.subr.bf16.mxu0 %v1168_v3  ;;  %v1364_v31 = vld [vmem:[%s1456_s4 + $0x38] sm:$0xff]   ;;  %v1199_v34 = vld [vmem:[%s1457_s2 + $0x10] sm:$0xff]   ;;  %v1201_v60 = vld [vmem:[%s1457_s2 + $0x20] sm:$0xff]  }
   0xd   :  { %v1200_v35 = vld [vmem:[%s1457_s2 + $0x18] sm:$0xff]   ;;  %v1202_v61 = vld [vmem:[%s1457_s2 + $0x28] sm:$0xff]   ;;  %v1203_v62 = vld [vmem:[%s1457_s2 + $0x30] sm:$0xff]  }
   0xe   :  { %1074 = vmatpush3.bf16.msra.mxu1 %v1185_v10  ;;  %v1204_v63 = vld [vmem:[%s1457_s2 + $0x38] sm:$0xff]  }
   0xf   :  { %1044 = vmatpush3.bf16.msra.mxu0 %v1168_v3  ;;  %1075 = vmatprep.subr.bf16.mxu1 %v1187_v12 }
  0x10   :  { %1045 = vmatprep.subr.bf16.mxu0 %v1169_v5 }
  0x12   :  { %1076 = vmatpush3.bf16.msra.mxu1 %v1187_v12 }
  0x13   :  { %1046 = vmatpush3.bf16.msra.mxu0 %v1169_v5  ;;  %1077 = vmatprep.subr.bf16.mxu1 %v1189_v14 }
  0x14   :  { %1047 = vmatprep.subr.bf16.mxu0 %v1170_v6 }
  0x16   :  { %1078 = vmatpush3.bf16.msra.mxu1 %v1189_v14 }
  0x17   :  { %1048 = vmatpush3.bf16.msra.mxu0 %v1170_v6  ;;  %1079 = vmatprep.subr.bf16.mxu1 %v1191_v18 }
  0x18   :  { %1049 = vmatprep.subr.bf16.mxu0 %v1171_v9 }
  0x1a   :  { %1080 = vmatpush3.bf16.msra.mxu1 %v1191_v18 }
  0x1b   :  { %1050 = vmatpush3.bf16.msra.mxu0 %v1171_v9  ;;  %1081 = vmatprep.subr.bf16.mxu1 %v1193_v20  ;;  %v1411_v9 = vld [vmem:[%s1458_s5] ss:$0 sm:$0xff] }
  0x1c   :  { %1051 = vmatprep.subr.bf16.mxu0 %v1172_v11 }
  0x1e   :  { %1082 = vmatpush3.bf16.msra.mxu1 %v1193_v20 }
  0x1f   :  { %1052 = vmatpush3.bf16.msra.mxu0 %v1172_v11  ;;  %1083 = vmatprep.subr.bf16.mxu1 %v1195_v30 }
  0x20   :  { %1101 = vmatprep.subr.bf16.mxu0 %v1282_v13 }
  0x22   :  { %1054 = vmatmul.mubr.bf16.vlgmr.msra.gmra.mrb[0].mxu0 %v1174_v15  ;;  %1084 = vmatpush3.bf16.msra.mxu1 %v1195_v30 }
  0x23   :  { %1057 = vmatprep.mubr.bf16.mxu0 %v1175_v16  ;;  %1102 = vmatpush3.bf16.msra.mxu0 %v1282_v13 }
  0x24   :  { %1103 = vmatprep.subr.bf16.mxu0 %v1297_v17  ;;  %1133 = vmatprep.subr.bf16.mxu1 %v1282_v13 }
  0x27   :  { %1104 = vmatpush3.bf16.msra.mxu0 %v1297_v17 }
  0x28   :  { %1105 = vmatprep.subr.bf16.mxu0 %v1307_v19 }
  0x2a   :  { %1058 = vmatmul.mubr.bf16.gmra.mrb[4].mxu0 %v1176_v21 }
  0x2b   :  { %1061 = vmatprep.mubr.bf16.mxu0 %v1177_v22  ;;  %1106 = vmatpush3.bf16.msra.mxu0 %v1307_v19 }
  0x2c   :  { %1107 = vmatprep.subr.bf16.mxu0 %v1323_v23 }
  0x2f   :  { %1108 = vmatpush3.bf16.msra.mxu0 %v1323_v23 }
  0x30   :  { %1109 = vmatprep.subr.bf16.mxu0 %v1330_v24 }
  0x32   :  { %1062 = vmatmul.mubr.bf16.gmra.mrb[8].mxu0 %v1178_v25 }
  0x33   :  { %1065 = vmatprep.mubr.bf16.mxu0 %v1179_v26  ;;  %1110 = vmatpush3.bf16.msra.mxu0 %v1330_v24 }
  0x34   :  { %1111 = vmatprep.subr.bf16.mxu0 %v1343_v27 }
  0x37   :  { %1112 = vmatpush3.bf16.msra.mxu0 %v1343_v27 }
  0x38   :  { %1113 = vmatprep.subr.bf16.mxu0 %v1350_v28 }
  0x3a   :  { %1066 = vmatmul.mubr.bf16.gmra.mrb[12].mxu0 %v1180_v29 }
  0x3b   :  { %1114 = vmatpush3.bf16.msra.mxu0 %v1350_v28  ;;  %1117 = vmatprep.mubr.bf16.mxu0 %v1197_v32 }
  0x3c   :  { %1115 = vmatprep.subr.bf16.mxu0 %v1364_v31 }
  0x3f   :  { %1116 = vmatpush3.bf16.msra.mxu0 %v1364_v31 }
  0x42   :  { %1118 = vmatmul.mubr.bf16.vlgmr.msra.gmra.mrb[16].mxu0 %v1198_v33 }
  0x43   :  { %1121 = vmatprep.mubr.bf16.mxu0 %v1199_v34 }
  0x4a   :  { %1122 = vmatmul.mubr.bf16.gmra.mrb[20].mxu0 %v1200_v35 }
  0xf5   :  { %v1055_v36 = vpop.f32.mrb[0].mxu0 }
  0xf6   :  { %v206_v37 = vpop.f32.mrb[1].mxu0 }
  0xf7   :  { %v1056_v38 = vpop.f32.mrb[2].mxu0 }
  0xf8   :  { %v286_v39 = vpack.c.bf16 %v1056_v38, %v1055_v36  ;;  %v209_v40 = vpop.f32.mrb[3].mxu0 }
  0xf9   :  { %v285_v41 = vpack.c.bf16 %v209_v40, %v206_v37 }
  0xfb   :  { %1085 = vmatprep.mubr.bf16.mxu1 %v285_v41 }
  0xfc   :  { %1086 = vmatmul.mubr.bf16.vlgmr.msra.gmra.mrb[0].mxu1 %v286_v39 }
  0xfd   :  { %1141 = vmatpush3.bf16.msra.mxu1 %v1282_v13  ;;  %v1059_v42 = vpop.f32.mrb[4].mxu0 }
  0xfe   :  { %v222_v43 = vpop.f32.mrb[5].mxu0  ;;  %1134 = vmatprep.subr.bf16.mxu1 %v1297_v17 }
  0xff   :  { %v1060_v44 = vpop.f32.mrb[6].mxu0 }
 0x100   :  { %v288_v45 = vpack.c.bf16 %v1060_v44, %v1059_v42  ;;  %v225_v46 = vpop.f32.mrb[7].mxu0 }
 0x101   :  { %v287_v47 = vpack.c.bf16 %v225_v46, %v222_v43  ;;  %1142 = vmatpush3.bf16.msra.mxu1 %v1297_v17 }
 0x102   :  { %1135 = vmatprep.subr.bf16.mxu1 %v1307_v19 }
 0x103   :  { %1089 = vmatprep.mubr.bf16.mxu1 %v287_v47 }
 0x104   :  { %1090 = vmatmul.mubr.bf16.gmra.mrb[4].mxu1 %v288_v45 }
 0x105   :  { %1143 = vmatpush3.bf16.msra.mxu1 %v1307_v19  ;;  %v1063_v48 = vpop.f32.mrb[8].mxu0 }
 0x106   :  { %v238_v49 = vpop.f32.mrb[9].mxu0  ;;  %1136 = vmatprep.subr.bf16.mxu1 %v1323_v23 }
 0x107   :  { %v1064_v50 = vpop.f32.mrb[10].mxu0 }
 0x108   :  { %v290_v51 = vpack.c.bf16 %v1064_v50, %v1063_v48  ;;  %v241_v52 = vpop.f32.mrb[11].mxu0 }
 0x109   :  { %v289_v53 = vpack.c.bf16 %v241_v52, %v238_v49  ;;  %1144 = vmatpush3.bf16.msra.mxu1 %v1323_v23 }
 0x10a   :  { %1137 = vmatprep.subr.bf16.mxu1 %v1330_v24 }
 0x10b   :  { %1093 = vmatprep.mubr.bf16.mxu1 %v289_v53 }
 0x10c   :  { %1094 = vmatmul.mubr.bf16.gmra.mrb[8].mxu1 %v290_v51 }
 0x10d   :  { %1145 = vmatpush3.bf16.msra.mxu1 %v1330_v24  ;;  %v1067_v54 = vpop.f32.mrb[12].mxu0 }
 0x10e   :  { %v254_v55 = vpop.f32.mrb[13].mxu0  ;;  %1138 = vmatprep.subr.bf16.mxu1 %v1343_v27 }
 0x10f   :  { %v1068_v56 = vpop.f32.mrb[14].mxu0 }
 0x110   :  { %v292_v57 = vpack.c.bf16 %v1068_v56, %v1067_v54  ;;  %v257_v58 = vpop.f32.mrb[15].mxu0 }
 0x111   :  { %v291_v59 = vpack.c.bf16 %v257_v58, %v254_v55  ;;  %1146 = vmatpush3.bf16.msra.mxu1 %v1343_v27 }
 0x112   :  { %1139 = vmatprep.subr.bf16.mxu1 %v1350_v28 }
 0x113   :  { %1097 = vmatprep.mubr.bf16.mxu1 %v291_v59 }
 0x114   :  { %1098 = vmatmul.mubr.bf16.gmra.mrb[12].mxu1 %v292_v57 }
 0x115   :  { %1147 = vmatpush3.bf16.msra.mxu1 %v1350_v28  ;;  %1125 = vmatprep.mubr.bf16.mxu1 %v1201_v60  ;;  %v1119_v0 = vpop.f32.mrb[16].mxu0 }
 0x116   :  { %1140 = vmatprep.subr.bf16.mxu1 %v1364_v31  ;;  %v651_v1 = vpop.f32.mrb[17].mxu0 }
 0x117   :  { %v1120_v2 = vpop.f32.mrb[18].mxu0 }
 0x118   :  { %v654_v3 = vpop.f32.mrb[19].mxu0 }
 0x119   :  { %1148 = vmatpush3.bf16.msra.mxu1 %v1364_v31 }
 0x11c   :  { %1126 = vmatmul.mubr.bf16.vlgmr.msra.gmra.mrb[8].mxu1 %v1202_v61 }
 0x11d   :  { %1129 = vmatprep.mubr.bf16.mxu1 %v1203_v62  ;;  %v1123_v4 = vpop.f32.mrb[20].mxu0 }
 0x11e   :  { %v667_v5 = vpop.f32.mrb[21].mxu0 }
 0x11f   :  { %v1124_v6 = vpop.f32.mrb[22].mxu0 }
 0x120   :  { %v670_v7 = vpop.f32.mrb[23].mxu0 }
 0x124   :  { %1130 = vmatmul.mubr.bf16.gmra.mrb[12].mxu1 %v1204_v63 }
 0x1cf   :  { %v1087_v8 = vpop.f32.mrb[0].mxu1 }
 0x1d0   :  { %v732_v10 = vadd.f32 %v1119_v0, %v1087_v8  ;;  %v391_v11 = vpop.f32.mrb[1].mxu1 }
 0x1d1   :  { %v730_v12 = vadd.f32 %v651_v1, %v391_v11  ;;  %v1088_v13 = vpop.f32.mrb[2].mxu1 }
 0x1d2   :  { %v755_v14 = vadd.f32 %v1411_v9, %v732_v10  ;;  %v733_v15 = vadd.f32 %v1120_v2, %v1088_v13  ;;  %v394_v16 = vpop.f32.mrb[3].mxu1 }
 0x1d3   :  { %v753_v17 = vadd.f32 %v1411_v9, %v730_v12  ;;  %v731_v18 = vadd.f32 %v654_v3, %v394_v16 }
 0x1d4   :  { %v756_v19 = vadd.f32 %v1411_v9, %v733_v15  ;;  %v771_v21 = vmax.f32 %v755_v14, 0.0 }
 0x1d5   :  { %v754_v20 = vadd.f32 %v1411_v9, %v731_v18  ;;  %v769_v23 = vmax.f32 %v753_v17, 0.0 }
 0x1d6   :  { %v772_v22 = vmax.f32 %v756_v19, 0.0 }
 0x1d7   :  { %v770_v24 = vmax.f32 %v754_v20, 0.0  ;;  %v1091_v25 = vpop.f32.mrb[4].mxu1 }
 0x1d8   :  { %v950_v26 = vpack.c.bf16 %v772_v22, %v771_v21  ;;  %v736_v27 = vadd.f32 %v1123_v4, %v1091_v25  ;;  %v407_v28 = vpop.f32.mrb[5].mxu1 }
 0x1d9   :  { %v945_v29 = vpack.c.bf16 %v770_v24, %v769_v23  ;;  %v734_v30 = vadd.f32 %v667_v5, %v407_v28  ;;  %v1092_v31 = vpop.f32.mrb[6].mxu1 }
 0x1da   :  { %982 = vst [vmem:[%s1459_s6 + $0x8] sm:$0xff] %v950_v26   ;;  %v759_v32 = vadd.f32 %v1411_v9, %v736_v27  ;;  %v737_v33 = vadd.f32 %v1124_v6, %v1092_v31  ;;  %v410_v34 = vpop.f32.mrb[7].mxu1 }
 0x1db   :  { %946 = vst [vmem:[%s1459_s6] sm:$0xff] %v945_v29   ;;  %v757_v35 = vadd.f32 %v1411_v9, %v734_v30  ;;  %v735_v36 = vadd.f32 %v670_v7, %v410_v34 }
 0x1dc   :  { %v760_v37 = vadd.f32 %v1411_v9, %v737_v33  ;;  %v775_v39 = vmax.f32 %v759_v32, 0.0 }
 0x1dd   :  { %v758_v38 = vadd.f32 %v1411_v9, %v735_v36  ;;  %v773_v41 = vmax.f32 %v757_v35, 0.0 }
 0x1de   :  { %v776_v40 = vmax.f32 %v760_v37, 0.0 }
 0x1df   :  { %v774_v42 = vmax.f32 %v758_v38, 0.0 }
 0x1e0   :  { %v960_v43 = vpack.c.bf16 %v776_v40, %v775_v39 }
 0x1e1   :  { %v955_v44 = vpack.c.bf16 %v774_v42, %v773_v41 }
 0x1e2   :  { %984 = vst [vmem:[%s1459_s6 + $0x18] sm:$0xff] %v960_v43  }
 0x1e3   :  { %983 = vst [vmem:[%s1459_s6 + $0x10] sm:$0xff] %v955_v44  }
 0x1ef   :  { %v1127_v45 = vpop.f32.mrb[8].mxu1 }
 0x1f0   :  { %v763_v46 = vadd.f32 %v1127_v45, %v1411_v9  ;;  %v683_v47 = vpop.f32.mrb[9].mxu1 }
 0x1f1   :  { %v761_v48 = vadd.f32 %v1411_v9, %v683_v47  ;;  %v1128_v49 = vpop.f32.mrb[10].mxu1 }
 0x1f2   :  { %v764_v50 = vadd.f32 %v1128_v49, %v1411_v9  ;;  %v686_v51 = vpop.f32.mrb[11].mxu1  ;;  %v779_v53 = vmax.f32 %v763_v46, 0.0 }
 0x1f3   :  { %v762_v52 = vadd.f32 %v1411_v9, %v686_v51  ;;  %v777_v55 = vmax.f32 %v761_v48, 0.0 }
 0x1f4   :  { %v780_v54 = vmax.f32 %v764_v50, 0.0 }
 0x1f5   :  { %v778_v56 = vmax.f32 %v762_v52, 0.0 }
 0x1f6   :  { %v970_v57 = vpack.c.bf16 %v780_v54, %v779_v53 }
 0x1f7   :  { %v965_v58 = vpack.c.bf16 %v778_v56, %v777_v55  ;;  %v1131_v59 = vpop.f32.mrb[12].mxu1 }
 0x1f8   :  { %986 = vst [vmem:[%s1459_s6 + $0x28] sm:$0xff] %v970_v57   ;;  %v767_v60 = vadd.f32 %v1131_v59, %v1411_v9  ;;  %v699_v61 = vpop.f32.mrb[13].mxu1 }
 0x1f9   :  { %985 = vst [vmem:[%s1459_s6 + $0x20] sm:$0xff] %v965_v58   ;;  %v765_v62 = vadd.f32 %v1411_v9, %v699_v61  ;;  %v1132_v63 = vpop.f32.mrb[14].mxu1 }
 0x1fa   :  { %v768_v0 = vadd.f32 %v1132_v63, %v1411_v9  ;;  %v702_v1 = vpop.f32.mrb[15].mxu1  ;;  %v783_v3 = vmax.f32 %v767_v60, 0.0 }
 0x1fb   :  { %v766_v2 = vadd.f32 %v1411_v9, %v702_v1  ;;  %v781_v5 = vmax.f32 %v765_v62, 0.0 }
 0x1fc   :  { %v784_v4 = vmax.f32 %v768_v0, 0.0 }
 0x1fd   :  { %v782_v6 = vmax.f32 %v766_v2, 0.0 }
 0x1fe   :  { %v980_v7 = vpack.c.bf16 %v784_v4, %v783_v3 }
 0x1ff   :  { %v975_v8 = vpack.c.bf16 %v782_v6, %v781_v5 }
 0x200   :  { %988 = vst [vmem:[%s1459_s6 + $0x38] sm:$0xff] %v980_v7  }
 0x201   :  { %987 = vst [vmem:[%s1459_s6 + $0x30] sm:$0xff] %v975_v8  }

</bundles_post_ra>
